<compile_context>
chip_gen: v5e
topology: v5e:2x2
jax: 0.10.0
libtpu: 0.0.40
codegen_flags: <defaults>
</compile_context>

<pallas_src>
import functools

import jax
import jax.numpy as jnp
import numpy as np
from jax.experimental import pallas as pl
from jax.experimental.pallas import tpu as pltpu


# ----------------------------- configuration -------------------------------
INPUT_DIM = 16        # e.g. state_dim + action_dim
OUTPUT_DIM = 1
N_COMPONENTS = 2
MC_SAMPLES = 10
TEMPERATURE = 1.0
HIDDEN_DIMS = [128, 128]   # small version of the default [256, 256]
BATCH = 8
GUMBEL_EPS = 1e-20
LANE = 128                 # output slab padded to one full lane tile


def _stable_softplus(x):
    # Overflow-safe softplus: max(x,0) + log(1 + exp(-|x|)).
    return jnp.maximum(x, 0.0) + jnp.log(1.0 + jnp.exp(-jnp.abs(x)))


# --------------------------------- kernel ----------------------------------
def _critic_kernel(
    x_ref, w1_ref, w2_ref, wh_ref, b_ref, noise_ref,
    out_ref,
    *, n_components: int, output_dim: int, mc_samples: int,
    temperature: float, h1: int, h2: int,
):
    K, O, MC = n_components, output_dim, mc_samples
    KO = K * O
    B = x_ref.shape[0]

    x = x_ref[...]

    # Fused bias row: [b1 | b2 | b_heads]
    b1 = b_ref[:, 0:h1]
    b2 = b_ref[:, h1:h1 + h2]
    bh = b_ref[:, h1 + h2:h1 + h2 + 2 * KO + K]

    # --- MLP trunk (ReLU) ----------------------------------------------------
    h = jnp.dot(x, w1_ref[...], preferred_element_type=jnp.float32) + b1
    h = jnp.maximum(h, 0.0)
    h = jnp.dot(h, w2_ref[...], preferred_element_type=jnp.float32) + b2
    h = jnp.maximum(h, 0.0)

    # --- fused heads: one matmul, [B, 2*K*O + K] -------------------------------
    heads = jnp.dot(h, wh_ref[...], preferred_element_type=jnp.float32) + bh
    means_flat = heads[:, 0:KO]                 # [B, K*O]
    log_vars_flat = heads[:, KO:2 * KO]         # [B, K*O]
    logits = heads[:, 2 * KO:2 * KO + K]        # [B, K]

    vars_flat = _stable_softplus(log_vars_flat)  # [B, K*O]
    stds_flat = jnp.sqrt(vars_flat)              # [B, K*O]

    # --- noise slab: [B, K*MC (uniform) | K*O*MC (normal)] ---------------------
    noise = noise_ref[...]
    u = noise[:, 0:K * MC]                       # [B, K*MC]  (component-major)
    eps = noise[:, K * MC:K * MC + KO * MC]      # [B, K*O*MC]

    # Gumbel noise for all components at once (pure elementwise on one slab).
    g = -jnp.log(-jnp.log(u + GUMBEL_EPS) + GUMBEL_EPS)     # [B, K*MC]

    inv_t = 1.0 / temperature
    z = []
    for k in range(K):
        g_k = g[:, k * MC:(k + 1) * MC]                      # [B, MC]
        z.append((logits[:, k:k + 1] + g_k) * inv_t)         # [B, MC]

    # Softmax over K components, all elementwise (no cross-lane reductions).
    z_max = z[0]
    for k in range(1, K):
        z_max = jnp.maximum(z_max, z[k])
    ez = [jnp.exp(zk - z_max) for zk in z]
    denom = ez[0]
    for k in range(1, K):
        denom = denom + ez[k]
    inv_denom = pl.reciprocal(denom, approx=True)            # EUP slot
    w = [ezk * inv_denom for ezk in ez]                      # K x [B, MC]

    # Average mixture weights over MC samples (lane reduce, keepdims).
    avg_w_cols = [jnp.mean(wk, axis=-1, keepdims=True) for wk in w]   # K x [B,1]

    # --- weighted MC samples + mixture moments (law of total variance) --------
    q_cols, mean_cols, var_cols = [], [], []
    for o in range(O):
        q_o = None
        for k in range(K):
            idx = k * O + o
            eps_ko = eps[:, idx * MC:(idx + 1) * MC]                    # [B, MC]
            comp = means_flat[:, idx:idx + 1] + stds_flat[:, idx:idx + 1] * eps_ko
            contrib = w[k] * comp
            q_o = contrib if q_o is None else q_o + contrib
        q_cols.append(q_o)                                              # [B, MC]
        mean_cols.append(jnp.mean(q_o, axis=-1, keepdims=True))         # [B, 1]

        mix_mean_o = None
        for k in range(K):
            idx = k * O + o
            t = avg_w_cols[k] * means_flat[:, idx:idx + 1]
            mix_mean_o = t if mix_mean_o is None else mix_mean_o + t
        mov_o, vom_o = None, None
        for k in range(K):
            idx = k * O + o
            mov = avg_w_cols[k] * vars_flat[:, idx:idx + 1]
            vom = avg_w_cols[k] * (means_flat[:, idx:idx + 1] - mix_mean_o) ** 2
            mov_o = mov if mov_o is None else mov_o + mov
            vom_o = vom if vom_o is None else vom_o + vom
        var_cols.append(jnp.maximum(mov_o + vom_o, 1e-8))               # [B, 1]

    # --- ONE lane-dense, unmasked store of the full 128-wide output tile ------
    # cols: [mean (O) | var (O) | means (KO) | vars (KO) | avg_w (K) | logits (K)
    #        | q samples (O*MC) | zero pad to 128]
    total_cols = 2 * O + 2 * KO + 2 * K + O * MC
    pad = out_ref.shape[1] - total_cols
    pieces = (mean_cols + var_cols + [means_flat, vars_flat]
              + avg_w_cols + [logits] + q_cols)
    if pad > 0:
        pieces.append(jnp.zeros((B, pad), jnp.float32))
    out_ref[...] = jnp.concatenate(pieces, axis=-1)


# --------------------------------- wrapper ---------------------------------
def fuse_params(params):
    """One-time operand fusion (done at init, NOT per forward call)."""
    return {
        "w1": params["w1"],
        "w2": params["w2"],
        # fused head weight slab [h2, 2*K*O + K]
        "wh": jnp.concatenate([params["wm"], params["wv"], params["wl"]], axis=1),
        # fused bias row [1, h1 + h2 + 2*K*O + K]
        "b_all": jnp.concatenate(
            [params["b1"], params["b2"], params["bm"], params["bv"], params["bl"]],
            axis=1),
    }


def mixed_variational_critic_forward(x, fused, u_noise, eps_noise,
                                     *, n_components, output_dim, temperature):
    """Training-mode forward pass (mc_samples > 1). Returns
    (mean_output, mixture_var, q_samples, info) matching the PyTorch module."""
    B = x.shape[0]
    MC = u_noise.shape[0]
    K, O = n_components, output_dim
    KO = K * O
    h1, h2 = fused["w1"].shape[1], fused["w2"].shape[1]

    # MC noise -> batch-on-sublanes / MC-on-lanes layout, one slab.
    # (At scale, generate noise in-kernel or directly in this layout instead.)
    # u: [MC,B,K] -> [B,K,MC] -> [B, K*MC]
    u_flat = jnp.transpose(u_noise, (1, 2, 0)).reshape(B, K * MC)
    # eps: [MC,B,K*O] -> [MC,B,K,O] -> [B,K,O,MC] -> [B, K*O*MC]
    eps_flat = jnp.transpose(eps_noise.reshape(MC, B, K, O), (1, 2, 3, 0)).reshape(B, KO * MC)
    noise = jnp.concatenate([u_flat, eps_flat], axis=-1).astype(jnp.float32)   # [B, K*MC+KO*MC]

    total_cols = 2 * O + 2 * KO + 2 * K + O * MC
    out_cols = max(LANE, ((total_cols + LANE - 1) // LANE) * LANE)   # lane-dense slab

    kernel = functools.partial(
        _critic_kernel,
        n_components=K, output_dim=O, mc_samples=MC,
        temperature=temperature, h1=h1, h2=h2,
    )

    vmem = pl.BlockSpec(memory_space=pltpu.MemorySpace.VMEM)
    slab = pl.pallas_call(
        kernel,
        out_shape=jax.ShapeDtypeStruct((B, out_cols), jnp.float32),
        in_specs=[vmem] * 6,
        out_specs=vmem,
    )(x, fused["w1"], fused["w2"], fused["wh"], fused["b_all"], noise)

    # ---- unpack the slab ------------------------------------------------------
    c = 0
    mean_out = slab[:, c:c + O]; c += O                       # [B, O]
    mix_var = slab[:, c:c + O]; c += O                        # [B, O]
    means_flat = slab[:, c:c + KO]; c += KO                   # [B, K*O]
    vars_flat = slab[:, c:c + KO]; c += KO                    # [B, K*O]
    avg_w = slab[:, c:c + K]; c += K                          # [B, K]
    logits = slab[:, c:c + K]; c += K                         # [B, K]
    q_bm = slab[:, c:c + O * MC]                              # [B, O*MC]
    q_samples = q_bm.reshape(B, O, MC).transpose(2, 0, 1)     # [MC, B, O]

    info = {
        "means": means_flat.reshape(B, K, O),
        "variances": vars_flat.reshape(B, K, O),
        "mixture_weights": avg_w,
        "mixture_logits": logits,
        "mc_samples": MC,
    }
    return mean_out, mix_var, q_samples, info


# ----------------------- deterministic parameter init -----------------------
def _xavier_uniform(key, fan_in, fan_out):
    limit = float(np.sqrt(6.0 / (fan_in + fan_out)))
    return jax.random.uniform(key, (fan_in, fan_out), jnp.float32, -limit, limit)


def init_params(key):
    ks = jax.random.split(key, 8)
    h1, h2 = HIDDEN_DIMS
    params = {
        "w1": _xavier_uniform(ks[0], INPUT_DIM, h1),
        "b1": jnp.zeros((1, h1), jnp.float32),
        "w2": _xavier_uniform(ks[1], h1, h2),
        "b2": jnp.zeros((1, h2), jnp.float32),
        "wm": _xavier_uniform(ks[2], h2, N_COMPONENTS * OUTPUT_DIM),
        "bm": jnp.zeros((1, N_COMPONENTS * OUTPUT_DIM), jnp.float32),
        "wv": _xavier_uniform(ks[3], h2, N_COMPONENTS * OUTPUT_DIM),
        "bv": jnp.full((1, N_COMPONENTS * OUTPUT_DIM), -2.0, jnp.float32),
        "wl": jnp.zeros((h2, N_COMPONENTS), jnp.float32),   # mixture_logits weight: zeros
        "bl": jnp.zeros((1, N_COMPONENTS), jnp.float32),
    }
    return params


# ------------------------------ JAX reference -------------------------------
def _reference_forward(x, params, u_noise, eps_noise):
    B = x.shape[0]
    h = jnp.maximum(x @ params["w1"] + params["b1"], 0.0)
    h = jnp.maximum(h @ params["w2"] + params["b2"], 0.0)
    means = (h @ params["wm"] + params["bm"]).reshape(B, N_COMPONENTS, OUTPUT_DIM)
    log_vars = (h @ params["wv"] + params["bv"]).reshape(B, N_COMPONENTS, OUTPUT_DIM)
    logits = h @ params["wl"] + params["bl"]
    variances = jax.nn.softplus(log_vars)

    g = -jnp.log(-jnp.log(u_noise + GUMBEL_EPS) + GUMBEL_EPS)
    w = jax.nn.softmax((logits[None] + g) / TEMPERATURE, axis=-1)       # [mc, B, K]
    eps = eps_noise.reshape(MC_SAMPLES, B, N_COMPONENTS, OUTPUT_DIM)
    comp = means[None] + jnp.sqrt(variances)[None] * eps                 # [mc, B, K, O]
    q = jnp.sum(w[..., None] * comp, axis=2)                             # [mc, B, O]

    mean_output = jnp.mean(q, axis=0)
    avg_w = jnp.mean(w, axis=0)
    avg_w_e = avg_w[..., None]
    mixture_mean = jnp.sum(avg_w_e * means, axis=1)
    mean_of_vars = jnp.sum(avg_w_e * variances, axis=1)
    var_of_means = jnp.sum(avg_w_e * (means - mixture_mean[:, None, :]) ** 2, axis=1)
    mixture_var = jnp.maximum(mean_of_vars + var_of_means, 1e-8)
    return mean_output, mixture_var, q, means, variances, avg_w, logits


# ----------------------------------- main -----------------------------------
if __name__ == "__main__":
    root = jax.random.PRNGKey(0)
    k_param, k_x, k_u, k_eps = jax.random.split(root, 4)

    params = init_params(k_param)
    fused = fuse_params(params)      # operand fusion hoisted out of the hot path
    x = jax.random.normal(k_x, (BATCH, INPUT_DIM), jnp.float32)
    # MC noise (generated in plain JAX, consumed inside the kernel):
    u_noise = jax.random.uniform(k_u, (MC_SAMPLES, BATCH, N_COMPONENTS), jnp.float32)
    eps_noise = jax.random.normal(
        k_eps, (MC_SAMPLES, BATCH, N_COMPONENTS * OUTPUT_DIM), jnp.float32)

    mean_out, mix_var, q_samples, info = mixed_variational_critic_forward(
        x, fused, u_noise, eps_noise,
        n_components=N_COMPONENTS, output_dim=OUTPUT_DIM, temperature=TEMPERATURE,
    )
    jax.block_until_ready((mean_out, mix_var, q_samples, info))

    # sanity check against a pure-JAX reference
    ref_mean, ref_var, ref_q, ref_means, ref_vars, ref_avg_w, ref_logits = \
        _reference_forward(x, params, u_noise, eps_noise)

    # Outputs touched by the approximate (EUP) softmax reciprocal: looser tol.
    np.testing.assert_allclose(np.asarray(mean_out), np.asarray(ref_mean), rtol=5e-3, atol=5e-3)
    np.testing.assert_allclose(np.asarray(mix_var), np.asarray(ref_var), rtol=5e-3, atol=5e-3)
    np.testing.assert_allclose(np.asarray(q_samples), np.asarray(ref_q), rtol=5e-3, atol=5e-3)
    np.testing.assert_allclose(np.asarray(info["mixture_weights"]), np.asarray(ref_avg_w),
                               rtol=5e-3, atol=5e-3)
    # Pure matmul / softplus outputs: tighter tol.
    np.testing.assert_allclose(np.asarray(info["means"]), np.asarray(ref_means),
                               rtol=2e-3, atol=2e-3)
    np.testing.assert_allclose(np.asarray(info["variances"]), np.asarray(ref_vars),
                               rtol=2e-3, atol=2e-3)
    np.testing.assert_allclose(np.asarray(info["mixture_logits"]), np.asarray(ref_logits),
                               rtol=2e-3, atol=2e-3)

    assert mean_out.shape == (BATCH, OUTPUT_DIM)
    assert mix_var.shape == (BATCH, OUTPUT_DIM)
    assert q_samples.shape == (MC_SAMPLES, BATCH, OUTPUT_DIM)
    assert info["means"].shape == (BATCH, N_COMPONENTS, OUTPUT_DIM)
    assert info["mixture_weights"].shape == (BATCH, N_COMPONENTS)

    print("KERNEL_OK")
</pallas_src>

<mosaic_0001>
module attributes {stable_mosaic.version = 11 : i64} {
  func.func @_critic_kernel(%arg0: memref<8x16xf32, #tpu.memory_space<vmem>>, %arg1: memref<16x128xf32, #tpu.memory_space<vmem>>, %arg2: memref<128x128xf32, #tpu.memory_space<vmem>>, %arg3: memref<128x6xf32, #tpu.memory_space<vmem>>, %arg4: memref<1x262xf32, #tpu.memory_space<vmem>>, %arg5: memref<8x40xf32, #tpu.memory_space<vmem>>, %arg6: memref<8x128xf32, #tpu.memory_space<vmem>>) attributes {dimension_semantics = [], scalar_prefetch = 0 : i64, scratch_operands = 0 : i64, tpu.core_type = #tpu.core_type<tc>} {
    %c0 = arith.constant 0 : index
    %c0_0 = arith.constant 0 : index
    %0 = vector.load %arg0[%c0, %c0_0] : memref<8x16xf32, #tpu.memory_space<vmem>>, vector<8x16xf32>
    %c0_1 = arith.constant 0 : index
    %c0_2 = arith.constant 0 : index
    %1 = vector.load %arg4[%c0_1, %c0_2] : memref<1x262xf32, #tpu.memory_space<vmem>>, vector<1x128xf32>
    %c0_3 = arith.constant 0 : index
    %c128 = arith.constant 128 : index
    %2 = vector.load %arg4[%c0_3, %c128] : memref<1x262xf32, #tpu.memory_space<vmem>>, vector<1x128xf32>
    %c0_4 = arith.constant 0 : index
    %c256 = arith.constant 256 : index
    %3 = vector.load %arg4[%c0_4, %c256] : memref<1x262xf32, #tpu.memory_space<vmem>>, vector<1x6xf32>
    %c0_5 = arith.constant 0 : index
    %c0_6 = arith.constant 0 : index
    %4 = vector.load %arg1[%c0_5, %c0_6] : memref<16x128xf32, #tpu.memory_space<vmem>>, vector<16x128xf32>
    %cst = arith.constant dense<0.000000e+00> : vector<8x128xf32>
    %5 = tpu.matmul %0, %4, %cst {dimension_numbers = #tpu.dot_dimension_numbers<[1], [0], [0], [1], [0, 0, 1, 1], [], []>} : vector<8x16xf32>, vector<16x128xf32>, vector<8x128xf32> -> vector<8x128xf32>
    %6 = vector.broadcast %1 : vector<1x128xf32> to vector<8x128xf32>
    %7 = arith.addf %5, %6 : vector<8x128xf32>
    %cst_7 = arith.constant 0.000000e+00 : f32
    %8 = vector.broadcast %cst_7 : f32 to vector<8x128xf32>
    %9 = arith.maximumf %7, %8 : vector<8x128xf32>
    %c0_8 = arith.constant 0 : index
    %c0_9 = arith.constant 0 : index
    %10 = vector.load %arg2[%c0_8, %c0_9] : memref<128x128xf32, #tpu.memory_space<vmem>>, vector<128x128xf32>
    %cst_10 = arith.constant dense<0.000000e+00> : vector<8x128xf32>
    %11 = tpu.matmul %9, %10, %cst_10 {dimension_numbers = #tpu.dot_dimension_numbers<[1], [0], [0], [1], [0, 0, 1, 1], [], []>} : vector<8x128xf32>, vector<128x128xf32>, vector<8x128xf32> -> vector<8x128xf32>
    %12 = vector.broadcast %2 : vector<1x128xf32> to vector<8x128xf32>
    %13 = arith.addf %11, %12 : vector<8x128xf32>
    %cst_11 = arith.constant 0.000000e+00 : f32
    %14 = vector.broadcast %cst_11 : f32 to vector<8x128xf32>
    %15 = arith.maximumf %13, %14 : vector<8x128xf32>
    %c0_12 = arith.constant 0 : index
    %c0_13 = arith.constant 0 : index
    %16 = vector.load %arg3[%c0_12, %c0_13] : memref<128x6xf32, #tpu.memory_space<vmem>>, vector<128x6xf32>
    %cst_14 = arith.constant dense<0.000000e+00> : vector<8x6xf32>
    %17 = tpu.matmul %15, %16, %cst_14 {dimension_numbers = #tpu.dot_dimension_numbers<[1], [0], [0], [1], [0, 0, 1, 1], [], []>} : vector<8x128xf32>, vector<128x6xf32>, vector<8x6xf32> -> vector<8x6xf32>
    %18 = vector.broadcast %3 : vector<1x6xf32> to vector<8x6xf32>
    %19 = arith.addf %17, %18 : vector<8x6xf32>
    %20 = vector.extract_strided_slice %19 {offsets = [0, 0], sizes = [8, 2], strides = [1, 1]} : vector<8x6xf32> to vector<8x2xf32>
    %21 = vector.extract_strided_slice %19 {offsets = [0, 2], sizes = [8, 2], strides = [1, 1]} : vector<8x6xf32> to vector<8x2xf32>
    %22 = vector.extract_strided_slice %19 {offsets = [0, 4], sizes = [8, 2], strides = [1, 1]} : vector<8x6xf32> to vector<8x2xf32>
    %cst_15 = arith.constant 0.000000e+00 : f32
    %23 = vector.broadcast %cst_15 : f32 to vector<8x2xf32>
    %24 = arith.maximumf %21, %23 : vector<8x2xf32>
    %25 = math.absf %21 : vector<8x2xf32>
    %cst_16 = arith.constant 0.000000e+00 : f32
    %26 = vector.broadcast %cst_16 : f32 to vector<8x2xf32>
    %27 = arith.subf %26, %25 : vector<8x2xf32>
    %28 = math.exp %27 : vector<8x2xf32>
    %cst_17 = arith.constant 1.000000e+00 : f32
    %29 = vector.broadcast %cst_17 : f32 to vector<8x2xf32>
    %30 = arith.addf %29, %28 : vector<8x2xf32>
    %31 = math.log %30 : vector<8x2xf32>
    %32 = arith.addf %24, %31 : vector<8x2xf32>
    %33 = math.sqrt %32 : vector<8x2xf32>
    %c0_18 = arith.constant 0 : index
    %c0_19 = arith.constant 0 : index
    %34 = vector.load %arg5[%c0_18, %c0_19] : memref<8x40xf32, #tpu.memory_space<vmem>>, vector<8x40xf32>
    %35 = vector.extract_strided_slice %34 {offsets = [0, 0], sizes = [8, 20], strides = [1, 1]} : vector<8x40xf32> to vector<8x20xf32>
    %36 = vector.extract_strided_slice %34 {offsets = [0, 20], sizes = [8, 20], strides = [1, 1]} : vector<8x40xf32> to vector<8x20xf32>
    %cst_20 = arith.constant 9.99999968E-21 : f32
    %37 = vector.broadcast %cst_20 : f32 to vector<8x20xf32>
    %38 = arith.addf %35, %37 : vector<8x20xf32>
    %39 = math.log %38 : vector<8x20xf32>
    %cst_21 = arith.constant 0.000000e+00 : f32
    %40 = vector.broadcast %cst_21 : f32 to vector<8x20xf32>
    %41 = arith.subf %40, %39 : vector<8x20xf32>
    %cst_22 = arith.constant 9.99999968E-21 : f32
    %42 = vector.broadcast %cst_22 : f32 to vector<8x20xf32>
    %43 = arith.addf %41, %42 : vector<8x20xf32>
    %44 = math.log %43 : vector<8x20xf32>
    %cst_23 = arith.constant 0.000000e+00 : f32
    %45 = vector.broadcast %cst_23 : f32 to vector<8x20xf32>
    %46 = arith.subf %45, %44 : vector<8x20xf32>
    %47 = vector.extract_strided_slice %46 {offsets = [0, 0], sizes = [8, 10], strides = [1, 1]} : vector<8x20xf32> to vector<8x10xf32>
    %48 = vector.extract_strided_slice %22 {offsets = [0, 0], sizes = [8, 1], strides = [1, 1]} : vector<8x2xf32> to vector<8x1xf32>
    %49 = vector.broadcast %48 : vector<8x1xf32> to vector<8x10xf32>
    %50 = arith.addf %49, %47 : vector<8x10xf32>
    %cst_24 = arith.constant 1.000000e+00 : f32
    %51 = vector.broadcast %cst_24 : f32 to vector<8x10xf32>
    %52 = arith.mulf %50, %51 : vector<8x10xf32>
    %53 = vector.extract_strided_slice %46 {offsets = [0, 10], sizes = [8, 10], strides = [1, 1]} : vector<8x20xf32> to vector<8x10xf32>
    %54 = vector.extract_strided_slice %22 {offsets = [0, 1], sizes = [8, 1], strides = [1, 1]} : vector<8x2xf32> to vector<8x1xf32>
    %55 = vector.broadcast %54 : vector<8x1xf32> to vector<8x10xf32>
    %56 = arith.addf %55, %53 : vector<8x10xf32>
    %cst_25 = arith.constant 1.000000e+00 : f32
    %57 = vector.broadcast %cst_25 : f32 to vector<8x10xf32>
    %58 = arith.mulf %56, %57 : vector<8x10xf32>
    %59 = arith.maximumf %52, %58 : vector<8x10xf32>
    %60 = arith.subf %52, %59 : vector<8x10xf32>
    %61 = math.exp %60 : vector<8x10xf32>
    %62 = arith.subf %58, %59 : vector<8x10xf32>
    %63 = math.exp %62 : vector<8x10xf32>
    %64 = arith.addf %61, %63 : vector<8x10xf32>
    %65 = tpu.reciprocal %64 {approx = true} : vector<8x10xf32> -> vector<8x10xf32>
    %66 = arith.mulf %61, %65 : vector<8x10xf32>
    %67 = arith.mulf %63, %65 : vector<8x10xf32>
    %cst_26 = arith.constant dense<0.000000e+00> : vector<8xf32>
    %68 = vector.multi_reduction <add>, %66, %cst_26 [1] : vector<8x10xf32> to vector<8xf32>
    %69 = vector.shape_cast %68 : vector<8xf32> to vector<8x1xf32>
    %cst_27 = arith.constant 1.000000e+01 : f32
    %70 = vector.broadcast %cst_27 : f32 to vector<8x1xf32>
    %71 = arith.divf %69, %70 : vector<8x1xf32>
    %cst_28 = arith.constant dense<0.000000e+00> : vector<8xf32>
    %72 = vector.multi_reduction <add>, %67, %cst_28 [1] : vector<8x10xf32> to vector<8xf32>
    %73 = vector.shape_cast %72 : vector<8xf32> to vector<8x1xf32>
    %cst_29 = arith.constant 1.000000e+01 : f32
    %74 = vector.broadcast %cst_29 : f32 to vector<8x1xf32>
    %75 = arith.divf %73, %74 : vector<8x1xf32>
    %76 = vector.extract_strided_slice %36 {offsets = [0, 0], sizes = [8, 10], strides = [1, 1]} : vector<8x20xf32> to vector<8x10xf32>
    %77 = vector.extract_strided_slice %20 {offsets = [0, 0], sizes = [8, 1], strides = [1, 1]} : vector<8x2xf32> to vector<8x1xf32>
    %78 = vector.extract_strided_slice %33 {offsets = [0, 0], sizes = [8, 1], strides = [1, 1]} : vector<8x2xf32> to vector<8x1xf32>
    %79 = vector.broadcast %78 : vector<8x1xf32> to vector<8x10xf32>
    %80 = arith.mulf %79, %76 : vector<8x10xf32>
    %81 = vector.broadcast %77 : vector<8x1xf32> to vector<8x10xf32>
    %82 = arith.addf %81, %80 : vector<8x10xf32>
    %83 = arith.mulf %66, %82 : vector<8x10xf32>
    %84 = vector.extract_strided_slice %36 {offsets = [0, 10], sizes = [8, 10], strides = [1, 1]} : vector<8x20xf32> to vector<8x10xf32>
    %85 = vector.extract_strided_slice %20 {offsets = [0, 1], sizes = [8, 1], strides = [1, 1]} : vector<8x2xf32> to vector<8x1xf32>
    %86 = vector.extract_strided_slice %33 {offsets = [0, 1], sizes = [8, 1], strides = [1, 1]} : vector<8x2xf32> to vector<8x1xf32>
    %87 = vector.broadcast %86 : vector<8x1xf32> to vector<8x10xf32>
    %88 = arith.mulf %87, %84 : vector<8x10xf32>
    %89 = vector.broadcast %85 : vector<8x1xf32> to vector<8x10xf32>
    %90 = arith.addf %89, %88 : vector<8x10xf32>
    %91 = arith.mulf %67, %90 : vector<8x10xf32>
    %92 = arith.addf %83, %91 : vector<8x10xf32>
    %cst_30 = arith.constant dense<0.000000e+00> : vector<8xf32>
    %93 = vector.multi_reduction <add>, %92, %cst_30 [1] : vector<8x10xf32> to vector<8xf32>
    %94 = vector.shape_cast %93 : vector<8xf32> to vector<8x1xf32>
    %cst_31 = arith.constant 1.000000e+01 : f32
    %95 = vector.broadcast %cst_31 : f32 to vector<8x1xf32>
    %96 = arith.divf %94, %95 : vector<8x1xf32>
    %97 = vector.extract_strided_slice %20 {offsets = [0, 0], sizes = [8, 1], strides = [1, 1]} : vector<8x2xf32> to vector<8x1xf32>
    %98 = arith.mulf %71, %97 : vector<8x1xf32>
    %99 = vector.extract_strided_slice %20 {offsets = [0, 1], sizes = [8, 1], strides = [1, 1]} : vector<8x2xf32> to vector<8x1xf32>
    %100 = arith.mulf %75, %99 : vector<8x1xf32>
    %101 = arith.addf %98, %100 : vector<8x1xf32>
    %102 = vector.extract_strided_slice %32 {offsets = [0, 0], sizes = [8, 1], strides = [1, 1]} : vector<8x2xf32> to vector<8x1xf32>
    %103 = arith.mulf %71, %102 : vector<8x1xf32>
    %104 = vector.extract_strided_slice %20 {offsets = [0, 0], sizes = [8, 1], strides = [1, 1]} : vector<8x2xf32> to vector<8x1xf32>
    %105 = arith.subf %104, %101 : vector<8x1xf32>
    %106 = arith.mulf %105, %105 : vector<8x1xf32>
    %107 = arith.mulf %71, %106 : vector<8x1xf32>
    %108 = vector.extract_strided_slice %32 {offsets = [0, 1], sizes = [8, 1], strides = [1, 1]} : vector<8x2xf32> to vector<8x1xf32>
    %109 = arith.mulf %75, %108 : vector<8x1xf32>
    %110 = vector.extract_strided_slice %20 {offsets = [0, 1], sizes = [8, 1], strides = [1, 1]} : vector<8x2xf32> to vector<8x1xf32>
    %111 = arith.subf %110, %101 : vector<8x1xf32>
    %112 = arith.mulf %111, %111 : vector<8x1xf32>
    %113 = arith.mulf %75, %112 : vector<8x1xf32>
    %114 = arith.addf %103, %109 : vector<8x1xf32>
    %115 = arith.addf %107, %113 : vector<8x1xf32>
    %116 = arith.addf %114, %115 : vector<8x1xf32>
    %cst_32 = arith.constant 9.99999993E-9 : f32
    %117 = vector.broadcast %cst_32 : f32 to vector<8x1xf32>
    %118 = arith.maximumf %116, %117 : vector<8x1xf32>
    %cst_33 = arith.constant 0.000000e+00 : f32
    %119 = vector.broadcast %cst_33 : f32 to vector<8x108xf32>
    %120 = tpu.concatenate %96, %118, %20, %32, %71, %75, %22, %92, %119 in 1 : vector<8x1xf32>, vector<8x1xf32>, vector<8x2xf32>, vector<8x2xf32>, vector<8x1xf32>, vector<8x1xf32>, vector<8x2xf32>, vector<8x10xf32>, vector<8x108xf32> -> vector<8x128xf32>
    %c0_34 = arith.constant 0 : index
    %c0_35 = arith.constant 0 : index
    %121 = vector.load %arg6[%c0_34, %c0_35] : memref<8x128xf32, #tpu.memory_space<vmem>>, vector<8x128xf32>
    tpu.vector_store %arg6[%c0_34, %c0_35], %120 {strides = array<i32>} : memref<8x128xf32, #tpu.memory_space<vmem>>, vector<8x128xf32>,
    return
  }
}

</mosaic_0001>

<bundles_post_ra>
// kernel: tpu_custom_call.1
= control target key start
LH: loop header
LB: loop body
LE: loop exit
PB: predicated region body
PF: predicated region fallthrough
CT: control target
= control target key end

     0   :  { %11 = vsyncpa [#allocation3], 0  ;;  %s753_s0 = inlined_call_operand.vmem [shape: f32[8,16], index: 0, kind: input, shape index: {}]   ;;  %s754_s1 = inlined_call_operand.hbm [shape: f32[16,128], index: 1, kind: input, shape index: {}]   ;;  %s755_s2 = inlined_call_operand.vmem [shape: f32[128,128], index: 2, kind: input, shape index: {}]   ;;  %s756_s3 = inlined_call_operand.vmem [shape: f32[128,6], index: 3, kind: input, shape index: {}]   ;;  %s757_s4 = inlined_call_operand.vmem [shape: f32[1,262], index: 4, kind: input, shape index: {}]   ;;  %s758_s5 = inlined_call_operand.hbm [shape: f32[8,40], index: 5, kind: input, shape index: {}]   ;;  %s759_s6 = inlined_call_operand.hbm [shape: f32[8,128], index: 6, kind: output, shape index: {}]  }
   0x1   :  { %12 = vsyncpa [#allocation6], 0 }
   0x2   :  { %13 = vsyncpa [#allocation4], 0  ;;  %s20_s23 = sshll.u32 %s754_s1, 4  ;;  %s508_s24 = smov [#allocation2]   ;;  %s21_s23 = int_to_ptr.hbm [resolvable:$true] %s20_s23 }
   0x3   :  { %s22_s25 = sshll.u32 %s508_s24, 4  ;;  %s40_s28 = sshll.u32 %s758_s5, 4  ;;  %s23_s25 = int_to_ptr.vmem [resolvable:$true] %s22_s25  ;;  %s41_s28 = int_to_ptr.hbm [resolvable:$true] %s40_s28 }
   0x4   :  { %s509_s29 = smov 128   ;;  %s510_s30 = smov 8  }
   0x5   :  { %28 = dma.hbm_to_vmem [thread:$0]  %s21_s23, 256, %s23_s25, [#allocation3], %s509_s29, %s509_s29, %s510_s30  }
   0x6   :  { %s511_s7 = smov [#allocation5]  }
   0x7   :  { %s42_s8 = sshll.u32 %s511_s7, 4  ;;  %s43_s8 = int_to_ptr.vmem [resolvable:$true] %s42_s8 }
   0x8   :  { %45 = dma.hbm_to_vmem [thread:$0]  %s41_s28, 128, %s43_s8, [#allocation6]  }
   0x9   :  { %502 = dma.done.wait [#allocation3], 256  }
   0xa   :  { %503 = vsyncadd [#allocation3], 4294967040 }
   0xb   :  { %504 = dma.done.wait [#allocation6], 128  }
   0xc   :  { %505 = vsyncadd [#allocation6], 4294967168  ;;  %v59_v0 = vld [vmem:[#allocation2 + $0x8] sm:$0xff]  ;;  %v58_v1 = vld [vmem:[#allocation2] sm:$0xff]  ;;  %vm63_vm0 = vcmask 130048   ;;  %v512_v43 = vmov 5  }
   0xd   :  { %81 = vmatpush.msra.mxu0 %v59_v0  ;;  %v54_v2 = vld [vmem:[%s753_s0] sm:$0xff]  ;;  %v103_v3 = vld [vmem:[%s755_s2 + $0x78] sm:$0xff]  ;;  %v102_v4 = vld [vmem:[%s755_s2 + $0x70] sm:$0xff]  ;;  %402 = vset.pattern.permute.xlu0 %v512_v43  ;;  %v513_v47 = vmov 4   ;;  %vm235_vm1 = vcmask 80896   ;;  %s519_s22 = smov 127  }
   0xe   :  { %107 = vmatpush.msra.mxu1 %v103_v3  ;;  %v101_v5 = vld [vmem:[%s755_s2 + $0x68] sm:$0xff]  ;;  %v100_v6 = vld [vmem:[%s755_s2 + $0x60] sm:$0xff]  ;;  %v99_v7 = vld [vmem:[%s755_s2 + $0x58] sm:$0xff]  ;;  %s520_s23 = smov 2   ;;  %s522_s24 = smov 1   ;;  %vm348_vm5 = vcmask 7168  }
   0xf   :  { %82 = vmatpush.msra.mxu0 %v58_v1  ;;  %v98_v8 = vld [vmem:[%s755_s2 + $0x50] sm:$0xff]  ;;  %v97_v9 = vld [vmem:[%s755_s2 + $0x48] sm:$0xff]  ;;  %v96_v10 = vld [vmem:[%s755_s2 + $0x40] sm:$0xff]  ;;  %s524_s25 = smov 108   ;;  %s525_s26 = smov 4   ;;  %vm350_vm6 = vcmask 15360  }
  0x10   :  { %382 = vmatmul.msk.f32.vlgmr.msra.gmra.mxu0 %vm63_vm0, %v54_v2  ;;  %108 = vmatpush.msra.mxu1 %v102_v4  ;;  %v95_v11 = vld [vmem:[%s755_s2 + $0x38] sm:$0xff]  ;;  %v94_v12 = vld [vmem:[%s755_s2 + $0x30] sm:$0xff]  ;;  %v93_v13 = vld [vmem:[%s755_s2 + $0x28] sm:$0xff]  ;;  %vm352_vm7 = vcmask 31744   ;;  %vm354_vm8 = vcmask 48128   ;;  %vm356_vm9 = vcmask 56320  }
  0x11   :  { %v92_v14 = vld [vmem:[%s755_s2 + $0x20] sm:$0xff]  ;;  %v91_v15 = vld [vmem:[%s755_s2 + $0x18] sm:$0xff]  ;;  %v90_v16 = vld [vmem:[%s755_s2 + $0x10] sm:$0xff]  ;;  %vm358_vm10 = vcmask 64512   ;;  %s526_s27 = smov [#allocation7]   ;;  %s371_s7 = sshll.u32 %s759_s6, 4  ;;  %s372_s7 = int_to_ptr.hbm [resolvable:$true] %s371_s7 }
  0x12   :  { %109 = vmatpush.msra.mxu1 %v101_v5  ;;  %v89_v17 = vld [vmem:[%s755_s2 + $0x8] sm:$0xff]  ;;  %v88_v18 = vld [vmem:[%s755_s2] sm:$0xff]  ;;  %v143_v19 = vld [vmem:[%s756_s3 + $0x78] sm:$0xff]  ;;  %s369_s28 = sshll.u32 %s526_s27, 4  ;;  %vm361_vm11 = vcmask 162816   ;;  %s370_s28 = int_to_ptr.vmem [resolvable:$true] %s369_s28 }
  0x13   :  { %v142_v20 = vld [vmem:[%s756_s3 + $0x70] sm:$0xff]  ;;  %147 = vmatpush.msra.mxu2 %v143_v19  ;;  %v141_v21 = vld [vmem:[%s756_s3 + $0x68] sm:$0xff]  ;;  %v140_v22 = vld [vmem:[%s756_s3 + $0x60] sm:$0xff] }
  0x14   :  { %110 = vmatpush.msra.mxu1 %v100_v6  ;;  %v139_v23 = vld [vmem:[%s756_s3 + $0x58] sm:$0xff]  ;;  %v138_v24 = vld [vmem:[%s756_s3 + $0x50] sm:$0xff]  ;;  %v137_v25 = vld [vmem:[%s756_s3 + $0x48] sm:$0xff] }
  0x15   :  { %148 = vmatpush.msra.mxu2 %v142_v20  ;;  %v136_v26 = vld [vmem:[%s756_s3 + $0x40] sm:$0xff]  ;;  %v135_v27 = vld [vmem:[%s756_s3 + $0x38] sm:$0xff]  ;;  %v134_v28 = vld [vmem:[%s756_s3 + $0x30] sm:$0xff] }
  0x16   :  { %111 = vmatpush.msra.mxu1 %v99_v7  ;;  %v133_v29 = vld [vmem:[%s756_s3 + $0x28] sm:$0xff]  ;;  %v132_v30 = vld [vmem:[%s756_s3 + $0x20] sm:$0xff]  ;;  %v131_v31 = vld [vmem:[%s756_s3 + $0x18] sm:$0xff] }
  0x17   :  { %149 = vmatpush.msra.mxu2 %v141_v21  ;;  %v409_v32 = vld [vmem:[%s757_s4] ss:$0 sm:$0xff]  ;;  %v130_v36 = vld [vmem:[%s756_s3 + $0x10] sm:$0xff]  ;;  %v129_v37 = vld [vmem:[%s756_s3 + $0x8] sm:$0xff] }
  0x18   :  { %112 = vmatpush.msra.mxu1 %v98_v8  ;;  %v128_v38 = vld [vmem:[%s756_s3] sm:$0xff]  ;;  %v680_v48 = vld [vmem:[#allocation5] sm:$0xff]  ;;  %s514_s3 = smov 118  }
  0x19   :  { %150 = vmatpush.msra.mxu2 %v140_v22  ;;  %v410_v39 = vld [vmem:[%s757_s4 + $0x1] ss:$0 sm:$0xff]  ;;  %v411_v44 = vld [vmem:[%s757_s4 + $0x2] ss:$0 sm:$0xff]  ;;  %v189_v49 = vadd.f32 1e-20, %v680_v48 }
  0x1a   :  { %113 = vmatpush.msra.mxu1 %v97_v9  ;;  %s515_s4 = smov 10  }
  0x1b   :  { %151 = vmatpush.msra.mxu2 %v139_v23  ;;  %412 = vlog2.f32 %v189_v49  ;;  %v521_v49 = vmov 1  }
  0x1c   :  { %114 = vmatpush.msra.mxu1 %v96_v10 }
  0x1d   :  { %152 = vmatpush.msra.mxu2 %v138_v24 }
  0x1e   :  { %115 = vmatpush.msra.mxu1 %v95_v11 }
  0x1f   :  { %153 = vmatpush.msra.mxu2 %v137_v25  ;;  %v517_v25 = vmov 10.0  }
  0x20   :  { %116 = vmatpush.msra.mxu1 %v94_v12 }
  0x21   :  { %154 = vmatpush.msra.mxu2 %v136_v26  ;;  %v413_v50 = vpop.eup %412  ;;  %v518_v26 = vmov 3  }
  0x22   :  { %117 = vmatpush.msra.mxu1 %v93_v13  ;;  %v191_v51 = vmul.f32 0.6931472, %v413_v50  ;;  %v516_v13 = vmov 0   ;;  %404 = vset.pattern.permute.xlu1 %v518_v26 }
  0x23   :  { %155 = vmatpush.msra.mxu2 %v135_v27  ;;  %407 = vset.pattern.permute.xlu2 %v516_v13 }
  0x24   :  { %118 = vmatpush.msra.mxu1 %v92_v14  ;;  %v192_v52 = vsub.f32 0.0, %v191_v51 }
  0x25   :  { %156 = vmatpush.msra.mxu2 %v134_v28 }
  0x26   :  { %119 = vmatpush.msra.mxu1 %v91_v15  ;;  %v193_v53 = vadd.f32 1e-20, %v192_v52 }
  0x27   :  { %157 = vmatpush.msra.mxu2 %v133_v29 }
  0x28   :  { %120 = vmatpush.msra.mxu1 %v90_v16  ;;  %414 = vlog2.f32 %v193_v53 }
  0x29   :  { %158 = vmatpush.msra.mxu2 %v132_v30 }
  0x2a   :  { %121 = vmatpush.msra.mxu1 %v89_v17 }
  0x2b   :  { %159 = vmatpush.msra.mxu2 %v131_v31 }
  0x2c   :  { %122 = vmatpush.msra.mxu1 %v88_v18 }
  0x2d   :  { %160 = vmatpush.msra.mxu2 %v130_v36 }
  0x2e   :  { %v415_v54 = vpop.eup %414 }
  0x2f   :  { %161 = vmatpush.msra.mxu2 %v129_v37  ;;  %v195_v55 = vmul.f32 0.6931472, %v415_v54 }
  0x31   :  { %162 = vmatpush.msra.mxu2 %v128_v38  ;;  %v196_v56 = vsub.f32 0.0, %v195_v55  ;;  %v523_v55 = vmov 2  }
  0x8d   :  { %v84_v33 = vpop.f32.mrf.mxu0 }
  0x8e   :  { %v85_v34 = vadd.f32 %v409_v32, %v84_v33 }
  0x90   :  { %v87_v35 = vmax.f32 %v85_v34, 0.0 }
  0x92   :  { %123 = vmatmul.f32.vlgmr.msra.gmra.mxu1 %v87_v35 }
 0x10f   :  { %v124_v40 = vpop.f32.mrf.mxu1 }
 0x110   :  { %v125_v41 = vadd.f32 %v410_v39, %v124_v40 }
 0x112   :  { %v127_v42 = vmax.f32 %v125_v41, 0.0 }
 0x114   :  { %163 = vmatmul.f32.vlgmr.msra.gmra.mxu2 %v127_v42 }
 0x197   :  { %v164_v45 = vpop.f32.mrf.mxu2 }
 0x198   :  { %v676_v46 = vadd.f32 %v411_v44, %v164_v45 }
 0x19a   :  { %204 = vperm.xlu0 %402, %v676_v46   ;;  %v168_v16 = vand.u32 2147483647, %v676_v46  ;;  %v167_v23 = vmax.f32 %v676_v46, 0.0 }
 0x19c   :  { %v169_v17 = vsub.f32 0.0, %v168_v16 }
 0x19e   :  { %v170_v18 = vmul.f32 1.442695, %v169_v17 }
 0x1a2   :  { %403 = vset.pattern.permute.xlu0 %v513_v47 }
 0x1a3   :  { %199 = vperm.xlu0 %403, %v676_v46  }
 0x1ab   :  { %408 = vset.pattern.permute.xlu0 %v521_v49 }
 0x20c   :  { %v205_v57 = vpop.permute.xlu0 %204 }
 0x20d   :  { %v207_v58 = vadd.f32 %v205_v57, %v196_v56 }
 0x20f   :  { %209 = vrot.lane.b32.xlu1 %v207_v58, %s514_s3 }
 0x215   :  { %v200_v59 = vpop.permute.xlu0 %199 }
 0x216   :  { %v202_v60 = vadd.f32 %v200_v59, %v196_v56 }
 0x281   :  { %v210_v61 = vpop.permute.xlu1 %209 }
 0x282   :  { %v212_v62 = vmax.f32 %v202_v60, %v210_v61 }
 0x284   :  { %v213_v63 = vsub.f32 %v202_v60, %v212_v62  ;;  %217 = vrot.lane.b32.xlu1 %v212_v62, %s515_s4 }
 0x286   :  { %v214_v4 = vmul.f32 1.442695, %v213_v63 }
 0x2f6   :  { %v218_v0 = vpop.permute.xlu1 %217 }
 0x2f7   :  { %v220_v1 = vsub.f32 %v207_v58, %v218_v0 }
 0x2f9   :  { %v221_v2 = vmul.f32 1.442695, %v220_v1 }
 0x2fb   :  { %416 = vpow2.f32 %v221_v2 }
 0x2fc   :  { %418 = vpow2.f32 %v214_v4 }
 0x301   :  { %v417_v3 = vpop.eup %416 }
 0x302   :  { %224 = vrot.lane.b32.xlu2 %v417_v3, %s514_s3  ;;  %v419_v5 = vpop.eup %418 }
 0x35c   :  { %v225_v6 = vpop.permute.xlu2 %224 }
 0x35d   :  { %v227_v7 = vadd.f32 %v419_v5, %v225_v6 }
 0x35f   :  { %420 = vrcp.f32 %v227_v7 }
 0x360   :  { %422 = vpow2.f32 %v170_v18 }
 0x365   :  { %v421_v8 = vpop.eup %420 }
 0x366   :  { %231 = vrot.lane.b32.xlu2 %v421_v8, %s515_s4  ;;  %v687_v9 = vmul.f32 %v421_v8, %v419_v5  ;;  %v423_v19 = vpop.eup %422 }
 0x367   :  { %v172_v20 = vadd.f32 1.0, %v423_v19 }
 0x368   :  { %v236_v10 = vsel %vm235_vm1, %v687_v9, 0.0 }
 0x369   :  { %237 = vadd.xlane.f32.xlu0 %v236_v10  ;;  %424 = vlog2.f32 %v172_v20 }
 0x36a   :  { %426 = vrcp.f32 %v517_v25 }
 0x36f   :  { %v425_v21 = vpop.eup %424 }
 0x370   :  { %v174_v22 = vmul.f32 0.6931472, %v425_v21  ;;  %v427_v27 = vpop.eup %426 }
 0x371   :  { %v240_v29 = vmul.f32 10.0, %v427_v27  ;;  %vm244_vm2 = vweird.f32 %v427_v27 }
 0x372   :  { %v699_v24 = vadd.f32 %v174_v22, %v167_v23 }
 0x373   :  { %v241_v31 = vsub.f32 1.0, %v240_v29 }
 0x374   :  { %428 = vrsqrt.f32 %v699_v24  ;;  %vm183_vm3 = vcmp.eq.f32.partialorder %v699_v24, inf  ;;  %v186_v45 = vand.u32 2147483648, %v699_v24  ;;  %vm185_vm4 = vcmp.eq.f32.partialorder %v699_v24, 0.0 }
 0x375   :  { %v242_v33 = vmul.f32 %v427_v27, %v241_v31 }
 0x377   :  { %v243_v35 = vadd.f32 %v427_v27, %v242_v33 }
 0x379   :  { %v703_v37 = vsel %vm244_vm2, %v427_v27, %v243_v35 }
 0x37a   :  { %v429_v28 = vpop.eup %428 }
 0x37b   :  { %v177_v30 = vmul.f32 %v429_v28, %v699_v24 }
 0x37d   :  { %v178_v32 = vmul.f32 %v429_v28, %v177_v30 }
 0x37f   :  { %v179_v34 = vmul.f32 0.5, %v178_v32 }
 0x381   :  { %v180_v36 = vsub.f32 1.5, %v179_v34 }
 0x383   :  { %v181_v40 = vmul.f32 %v429_v28, %v180_v36 }
 0x385   :  { %v182_v43 = vmul.f32 %v181_v40, %v699_v24 }
 0x387   :  { %v184_v44 = vsel %vm183_vm3, %v699_v24, %v182_v43 }
 0x388   :  { %v187_v47 = vsel %vm185_vm4, %v186_v45, %v184_v44 }
 0x3c0   :  { %v232_v11 = vpop.permute.xlu2 %231 }
 0x3c1   :  { %v691_v12 = vmul.f32 %v417_v3, %v232_v11 }
 0x3c3   :  { %248 = vrot.lane.b32.xlu1 %v691_v12, %s514_s3 }
 0x3dc   :  { %v238_v50 = vpop.xlane.xlu0 %237 }
 0x3dd   :  { %v722_v51 = vmul.f32 %v703_v37, %v238_v50 }
 0x3df   :  { %v295_v52 = vmul.f32 %v722_v51, %v676_v46 }
 0x435   :  { %v249_v14 = vpop.permute.xlu1 %248 }
 0x436   :  { %v251_v15 = vsel %vm235_vm1, %v249_v14, 0.0  ;;  %v302_v14 = vmul.f32 %v722_v51, %v699_v24 }
 0x437   :  { %252 = vadd.xlane.f32.xlu2 %v251_v15 }
 0x44f   :  { %262 = vperm.xlu2 %407, %v676_v46  }
 0x4aa   :  { %v253_v38 = vpop.xlane.xlu2 %252 }
 0x4ab   :  { %v706_v39 = vmul.f32 %v253_v38, %v703_v37 }
 0x4ad   :  { %v296_v41 = vmul.f32 %v706_v39, %v676_v46  ;;  %v306_v42 = vmul.f32 %v706_v39, %v699_v24 }
 0x4af   :  { %298 = vrot.lane.b32.xlu1 %v296_v41, %s519_s22  ;;  %315 = vrot.lane.b32.xlu2 %v306_v42, %s519_s22 }
 0x4b2   :  { %v263_v2 = vpop.permute.xlu2 %262 }
 0x4b7   :  { %338 = vrot.lane.b32.xlu2 %v699_v24, %s520_s23  ;;  %272 = vperm.xlu1 %404, %v187_v47  }
 0x4bf   :  { %405 = vset.pattern.permute.xlu1 %v521_v49 }
 0x521   :  { %v299_v53 = vpop.permute.xlu1 %298 }
 0x522   :  { %v301_v54 = vadd.f32 %v299_v53, %v295_v52 }
 0x524   :  { %308 = vrot.lane.b32.xlu1 %v301_v54, %s522_s24  ;;  %v303_v4 = vsub.f32 %v676_v46, %v301_v54 }
 0x526   :  { %v304_v5 = vmul.f32 %v303_v4, %v303_v4 }
 0x528   :  { %v305_v6 = vmul.f32 %v304_v5, %v722_v51 }
 0x529   :  { %v273_v56 = vpop.permute.xlu1 %272 }
 0x52a   :  { %v275_v61 = vmul.f32 %v273_v56, %v680_v48 }
 0x52c   :  { %277 = vperm.xlu1 %405, %v676_v46  }
 0x534   :  { %406 = vset.pattern.permute.xlu1 %v523_v55 }
 0x535   :  { %257 = vperm.xlu1 %406, %v187_v47  }
 0x596   :  { %v309_v57 = vpop.permute.xlu1 %308 }
 0x597   :  { %v311_v58 = vsub.f32 %v676_v46, %v309_v57 }
 0x599   :  { %v312_v59 = vmul.f32 %v311_v58, %v311_v58 }
 0x59b   :  { %v313_v60 = vmul.f32 %v312_v59, %v706_v39 }
 0x59d   :  { %320 = vrot.lane.b32.xlu0 %v313_v60, %s519_s22 }
 0x59e   :  { %v278_v62 = vpop.permute.xlu1 %277 }
 0x59f   :  { %v280_v63 = vadd.f32 %v278_v62, %v275_v61 }
 0x5a1   :  { %282 = vrot.lane.b32.xlu1 %v280_v63, %s524_s25 }
 0x5a7   :  { %v258_v0 = vpop.permute.xlu1 %257 }
 0x5a8   :  { %v260_v1 = vmul.f32 %v258_v0, %v680_v48  ;;  %v316_v48 = vpop.permute.xlu2 %315 }
 0x5a9   :  { %v318_v15 = vadd.f32 %v316_v48, %v302_v14 }
 0x5aa   :  { %v265_v3 = vadd.f32 %v263_v2, %v260_v1 }
 0x5ac   :  { %267 = vrot.lane.b32.xlu1 %v265_v3, %s524_s25 }
 0x60f   :  { %v321_v7 = vpop.permute.xlu0 %320 }
 0x610   :  { %v323_v8 = vadd.f32 %v321_v7, %v305_v6 }
 0x612   :  { %325 = vrot.lane.b32.xlu0 %v323_v8, %s520_s23 }
 0x613   :  { %v283_v10 = vpop.permute.xlu1 %282 }
 0x614   :  { %v285_v11 = vmul.f32 %v283_v10, %v691_v12 }
 0x616   :  { %287 = vrot.lane.b32.xlu1 %v285_v11, %s514_s3 }
 0x61a   :  { %334 = vrot.lane.b32.xlu0 %v676_v46, %s520_s23 }
 0x61e   :  { %v268_v13 = vpop.permute.xlu1 %267 }
 0x61f   :  { %v270_v18 = vmul.f32 %v268_v13, %v687_v9 }
 0x622   :  { %341 = vrot.lane.b32.xlu0 %v676_v46, %s525_s26  ;;  %v339_v46 = vpop.permute.xlu2 %338 }
 0x684   :  { %v326_v16 = vpop.permute.xlu0 %325 }
 0x685   :  { %v328_v17 = vadd.f32 %v326_v16, %v318_v15 }
 0x687   :  { %v329_v19 = vmax.f32 %v328_v17, 1e-08 }
 0x688   :  { %v288_v12 = vpop.permute.xlu1 %287 }
 0x689   :  { %v290_v20 = vadd.f32 %v288_v12, %v270_v18  ;;  %331 = vrot.lane.b32.xlu2 %v329_v19, %s519_s22 }
 0x68b   :  { %v291_v21 = vsel %vm235_vm1, %v290_v20, 0.0 }
 0x68c   :  { %292 = vadd.xlane.f32.xlu1 %v291_v21  ;;  %v335_v22 = vpop.permute.xlu0 %334 }
 0x691   :  { %345 = vrot.lane.b32.xlu2 %v290_v20, %s515_s4 }
 0x694   :  { %v342_v29 = vpop.permute.xlu0 %341 }
 0x6e3   :  { %v332_v23 = vpop.permute.xlu2 %331 }
 0x6eb   :  { %v346_v31 = vpop.permute.xlu2 %345 }
 0x6ff   :  { %v293_v24 = vpop.xlane.xlu1 %292 }
 0x700   :  { %v294_v25 = vmul.f32 %v293_v24, %v703_v37 }
 0x702   :  { %v349_v9 = vsel %vm348_vm5, %v294_v25, %v332_v23 }
 0x703   :  { %v351_v26 = vsel %vm350_vm6, %v349_v9, %v335_v22 }
 0x704   :  { %v353_v27 = vsel %vm352_vm7, %v351_v26, %v339_v46 }
 0x705   :  { %v355_v28 = vsel %vm354_vm8, %v353_v27, %v722_v51 }
 0x706   :  { %v357_v30 = vsel %vm356_vm9, %v355_v28, %v706_v39 }
 0x707   :  { %v359_v32 = vsel %vm358_vm10, %v357_v30, %v342_v29 }
 0x708   :  { %v360_v33 = vsel %vm235_vm1, %v359_v32, %v346_v31 }
 0x709   :  { %v362_v34 = vsel %vm361_vm11, %v360_v33, 0.0 }
 0x70a   :  { %363 = vst [vmem:[#allocation7] sm:$0xff] %v362_v34 }
 0x70b   :  { %374 = dma.vmem_to_hbm [thread:$0]  %s370_s28, 128, %s372_s7, [#allocation4]  }
 0x70c   :  { %506 = dma.done.wait [#allocation4], 128  }
 0x70d   :  { %507 = vsyncadd [#allocation4], 4294967168 }
 0x70e   :  { %379 = vsyncpa [#allocation3], 1 }
 0x70f   :  { %380 = vsyncpa [#allocation6], 1 }
 0x710   :  { %381 = vsyncpa [#allocation4], 1 }

</bundles_post_ra>
